<compile_context>
chip_gen: v6e
topology: v6e:2x2x1
jax: 0.10.0
libtpu: 0.0.40
codegen_flags: <defaults>
</compile_context>

<pallas_src>
import jax
import jax.numpy as jnp
from jax.experimental import pallas as pl
from jax.experimental.pallas import tpu as pltpu


def _patch_embed_gemm_kernel(p_ref, w_ref, b_ref, o_ref):
    """One grid step = one row-tile of patches.

    p_ref: (tm, K)  VMEM   im2col'd patches
    w_ref: (K, E)   VMEM   flattened conv weight (pre-transposed)
    b_ref: (1, E)   VMEM   conv bias
    o_ref: (tm, E)  VMEM
    """
    acc = jnp.dot(p_ref[...], w_ref[...], preferred_element_type=jnp.float32)
    o_ref[...] = (acc + b_ref[...]).astype(o_ref.dtype)


def _pick_row_tile(m):
    """Largest convenient sublane-aligned tile that divides m, else full m."""
    for t in (1024, 512, 256, 128, 64, 32, 16, 8):
        if m >= t and m % t == 0:
            return t
    return m


def patch_embed_forward(x, weight, bias, patch_size):
    """x: (B, Cin, H, W); weight: (E, Cin, p, p) [PyTorch conv layout]; bias: (E,)."""
    B, Cin, H, W = x.shape
    p = patch_size
    E = weight.shape[0]
    gh, gw = H // p, W // p
    num_patches = gh * gw
    K = Cin * p * p
    M = B * num_patches

    # im2col: (B, Cin, gh, p, gw, p) -> (B, gh, gw, Cin, p, p) -> (M, K).
    # Row order (b, gi, gj) and col order (c, i, j) match conv->flatten(2)->transpose(1,2).
    patches = (
        x.reshape(B, Cin, gh, p, gw, p)
        .transpose(0, 2, 4, 1, 3, 5)
        .reshape(M, K)
    )
    wf = weight.reshape(E, K).T            # (K, E): y = patches @ wf + bias
    b2 = bias.reshape(1, E)

    tm = _pick_row_tile(M)
    grid = (M // tm,)

    cost = pl.CostEstimate(
        flops=2 * M * K * E,
        transcendentals=0,
        bytes_accessed=(M * K + K * E + E + M * E) * x.dtype.itemsize,
    )

    out_flat = pl.pallas_call(
        _patch_embed_gemm_kernel,
        out_shape=jax.ShapeDtypeStruct((M, E), x.dtype),
        grid=grid,
        in_specs=[
            pl.BlockSpec((tm, K), lambda i: (i, 0)),
            pl.BlockSpec((K, E), lambda i: (0, 0)),
            pl.BlockSpec((1, E), lambda i: (0, 0)),
        ],
        out_specs=pl.BlockSpec((tm, E), lambda i: (i, 0)),
        compiler_params=pltpu.CompilerParams(dimension_semantics=("parallel",)),
        cost_estimate=cost,
    )(patches, wf, b2)

    return out_flat.reshape(B, num_patches, E)


def reference_patch_embed(x, weight, bias, patch_size):
    """Plain-JAX reference mirroring the PyTorch forward (Conv2d + flatten + transpose)."""
    p = patch_size
    y = jax.lax.conv_general_dilated(
        x, weight, window_strides=(p, p), padding="VALID",
        dimension_numbers=("NCHW", "OIHW", "NCHW"),
    )
    B, E, gh, gw = y.shape
    y = y + bias.reshape(1, E, 1, 1)
    return y.reshape(B, E, gh * gw).transpose(0, 2, 1)


if __name__ == "__main__":
    # Small shapes consistent with the module: img=16, patch=8, embed_dim=32.
    B, Cin, IMG, P, EMB = 2, 3, 16, 8, 32

    key = jax.random.PRNGKey(0)
    kx, kw, kb = jax.random.split(key, 3)

    x = jax.random.normal(kx, (B, Cin, IMG, IMG), dtype=jnp.float32)
    # nn.Conv2d(3, embed_dim, kernel_size=patch, stride=patch): weight (E, Cin, p, p), bias (E,)
    weight = jax.random.normal(kw, (EMB, Cin, P, P), dtype=jnp.float32) * 0.05
    bias = jax.random.normal(kb, (EMB,), dtype=jnp.float32) * 0.05

    out = patch_embed_forward(x, weight, bias, P)
    out = jax.block_until_ready(out)

    ref = reference_patch_embed(x, weight, bias, P)
    num_patches = (IMG // P) * (IMG // P)
    assert out.shape == (B, num_patches, EMB)
    assert jnp.allclose(out, ref, atol=1e-4, rtol=1e-4), "mismatch vs reference"

    print("KERNEL_OK")
</pallas_src>

<mosaic_0001>
module attributes {stable_mosaic.version = 11 : i64} {
  func.func @_patch_embed_gemm_kernel(%arg0: i32, %arg1: memref<8x192xf32, #tpu.memory_space<vmem>>, %arg2: memref<192x32xf32, #tpu.memory_space<vmem>>, %arg3: memref<1x32xf32, #tpu.memory_space<vmem>>, %arg4: memref<8x32xf32, #tpu.memory_space<vmem>>) attributes {dimension_semantics = [#tpu.dimension_semantics<parallel>], iteration_bounds = array<i64: 1>, scalar_prefetch = 0 : i64, scratch_operands = 0 : i64, tpu.core_type = #tpu.core_type<tc>, window_params = [{transform_indices = @transform_0, window_bounds = array<i64: 8, 192>}, {pipeline_mode = #tpu.pipeline_mode<synchronous>, transform_indices = @transform_1, window_bounds = array<i64: 192, 32>}, {pipeline_mode = #tpu.pipeline_mode<synchronous>, transform_indices = @transform_2, window_bounds = array<i64: 1, 32>}, {transform_indices = @transform_3, window_bounds = array<i64: 8, 32>}]} {
    %c0 = arith.constant 0 : index
    %c0_0 = arith.constant 0 : index
    %0 = vector.load %arg1[%c0, %c0_0] : memref<8x192xf32, #tpu.memory_space<vmem>>, vector<8x192xf32>
    %c0_1 = arith.constant 0 : index
    %c0_2 = arith.constant 0 : index
    %1 = vector.load %arg2[%c0_1, %c0_2] : memref<192x32xf32, #tpu.memory_space<vmem>>, vector<192x32xf32>
    %cst = arith.constant dense<0.000000e+00> : vector<8x32xf32>
    %2 = tpu.matmul %0, %1, %cst {dimension_numbers = #tpu.dot_dimension_numbers<[1], [0], [0], [1], [0, 0, 1, 1], [], []>} : vector<8x192xf32>, vector<192x32xf32>, vector<8x32xf32> -> vector<8x32xf32>
    %c0_3 = arith.constant 0 : index
    %c0_4 = arith.constant 0 : index
    %3 = vector.load %arg3[%c0_3, %c0_4] : memref<1x32xf32, #tpu.memory_space<vmem>>, vector<1x32xf32>
    %4 = vector.broadcast %3 : vector<1x32xf32> to vector<8x32xf32>
    %5 = arith.addf %2, %4 : vector<8x32xf32>
    %c0_5 = arith.constant 0 : index
    %c0_6 = arith.constant 0 : index
    %6 = vector.load %arg4[%c0_5, %c0_6] : memref<8x32xf32, #tpu.memory_space<vmem>>, vector<8x32xf32>
    tpu.vector_store %arg4[%c0_5, %c0_6], %5 {strides = array<i32>} : memref<8x32xf32, #tpu.memory_space<vmem>>, vector<8x32xf32>,
    return
  }
  func.func @transform_0(%arg0: i32) -> (i32, i32) {
    %c0_i32 = arith.constant 0 : i32
    %c0_i32_0 = arith.constant 0 : i32
    return %arg0, %c0_i32 : i32, i32
  }
  func.func @transform_1(%arg0: i32) -> (i32, i32) {
    %c0_i32 = arith.constant 0 : i32
    %c0_i32_0 = arith.constant 0 : i32
    %c0_i32_1 = arith.constant 0 : i32
    return %c0_i32, %c0_i32_0 : i32, i32
  }
  func.func @transform_2(%arg0: i32) -> (i32, i32) {
    %c0_i32 = arith.constant 0 : i32
    %c0_i32_0 = arith.constant 0 : i32
    %c0_i32_1 = arith.constant 0 : i32
    return %c0_i32, %c0_i32_0 : i32, i32
  }
  func.func @transform_3(%arg0: i32) -> (i32, i32) {
    %c0_i32 = arith.constant 0 : i32
    %c0_i32_0 = arith.constant 0 : i32
    return %arg0, %c0_i32 : i32, i32
  }
}

</mosaic_0001>

<bundles_post_ra>
// kernel: tpu_custom_call.1
= control target key start
LH: loop header
LB: loop body
LE: loop exit
PB: predicated region body
PF: predicated region fallthrough
CT: control target
= control target key end

     0   :  { %v164_v1 = vmov 0.0   ;;  %vm48_vm0 = vcmask 523264   ;;  %s294_s0 = inlined_call_operand.vmem [shape: f32[8,192], index: 0, kind: input, shape index: {}]   ;;  %s295_s1 = inlined_call_operand.vmem [shape: f32[192,32], index: 1, kind: input, shape index: {}]   ;;  %s296_s2 = inlined_call_operand.vmem [shape: f32[1,32], index: 2, kind: input, shape index: {}]   ;;  %s297_s3 = inlined_call_operand.hbm [shape: f32[8,32], index: 3, kind: output, shape index: {}]  }
   0x1   :  { %v32_v0 = vld [vmem:[%s295_s1 + $0x78] sm:$0xff]  ;;  %52 = vmatprep.subr.mxu0 %v164_v1  ;;  %v31_v2 = vld [vmem:[%s295_s1 + $0x70] sm:$0xff]  ;;  %v30_v3 = vld [vmem:[%s295_s1 + $0x68] sm:$0xff] }
   0x2   :  { %53 = vmatpush1.msra.mxu0 %v32_v0  ;;  %v29_v4 = vld [vmem:[%s295_s1 + $0x60] sm:$0xff]  ;;  %v28_v5 = vld [vmem:[%s295_s1 + $0x58] sm:$0xff]  ;;  %v16_v6 = vld [vmem:[%s294_s0 + $0x8] sm:$0xff] }
   0x3   :  { %54 = vmatprep.subr.mxu0 %v164_v1  ;;  %v27_v7 = vld [vmem:[%s295_s1 + $0x50] sm:$0xff]  ;;  %139 = vmatprep.mubr.msk.f32.mxu0 %vm48_vm0, %v16_v6 }
   0x4   :  { %55 = vmatpush1.msra.mxu0 %v31_v2 }
   0x5   :  { %56 = vmatprep.subr.mxu0 %v164_v1 }
   0x6   :  { %57 = vmatpush1.msra.mxu0 %v30_v3 }
   0x7   :  { %58 = vmatprep.subr.mxu0 %v164_v1 }
   0x8   :  { %59 = vmatpush1.msra.mxu0 %v29_v4 }
   0x9   :  { %60 = vmatprep.subr.mxu0 %v164_v1 }
   0xa   :  { %8 = vsyncpa [#allocation3], 0  ;;  %61 = vmatpush1.msra.mxu0 %v28_v5  ;;  %v26_v8 = vld [vmem:[%s295_s1 + $0x48] sm:$0xff]  ;;  %v25_v9 = vld [vmem:[%s295_s1 + $0x40] sm:$0xff]  ;;  %s165_s12 = smov [#allocation2]   ;;  %vm122_vm1 = vcmask 261120  }
   0xb   :  { %62 = vmatprep.subr.mxu0 %v164_v1  ;;  %v24_v10 = vld [vmem:[%s295_s1 + $0x38] sm:$0xff]  ;;  %v23_v11 = vld [vmem:[%s295_s1 + $0x30] sm:$0xff]  ;;  %v22_v12 = vld [vmem:[%s295_s1 + $0x28] sm:$0xff]  ;;  %s130_s13 = sshll.u32 %s165_s12, 4  ;;  %s131_s13 = int_to_ptr.vmem [resolvable:$true] %s130_s13 }
   0xc   :  { %63 = vmatpush1.msra.mxu0 %v27_v7  ;;  %v21_v13 = vld [vmem:[%s295_s1 + $0x20] sm:$0xff]  ;;  %v20_v14 = vld [vmem:[%s295_s1 + $0x18] sm:$0xff]  ;;  %v19_v15 = vld [vmem:[%s295_s1 + $0x10] sm:$0xff]  ;;  %p147_p1 = scmp.lt.s32.totalorder %s131_s13, %s131_s13 }
   0xd   :  { %64 = vmatprep.subr.mxu0 %v164_v1  ;;  %v18_v16 = vld [vmem:[%s295_s1 + $0x8] sm:$0xff]  ;;  %v17_v17 = vld [vmem:[%s295_s1] sm:$0xff]  ;;  %v40_v18 = vld [vmem:[%s295_s1 + $0xb8] sm:$0xff] }
   0xe   :  { %65 = vmatpush1.msra.mxu0 %v26_v8  ;;  %v39_v19 = vld [vmem:[%s295_s1 + $0xb0] sm:$0xff]  ;;  %v38_v20 = vld [vmem:[%s295_s1 + $0xa8] sm:$0xff]  ;;  %v37_v21 = vld [vmem:[%s295_s1 + $0xa0] sm:$0xff] }
   0xf   :  { %66 = vmatprep.subr.mxu0 %v164_v1  ;;  %v36_v22 = vld [vmem:[%s295_s1 + $0x98] sm:$0xff]  ;;  %v35_v23 = vld [vmem:[%s295_s1 + $0x90] sm:$0xff]  ;;  %v34_v24 = vld [vmem:[%s295_s1 + $0x88] sm:$0xff] }
  0x10   :  { %67 = vmatpush1.msra.mxu0 %v25_v9  ;;  %v33_v25 = vld [vmem:[%s295_s1 + $0x80] sm:$0xff]  ;;  %s142_s1 = scalar_lea.vmem %s131_s13, 128 }
  0x11   :  { %68 = vmatprep.subr.mxu0 %v164_v1  ;;  %v15_v26 = vld [vmem:[%s294_s0] sm:$0xff]  ;;  %p143_p0 = scmp.ne.s32.totalorder %s131_s13, %s142_s1  ;;  %p148_p2 = scmp.lt.s32.totalorder %s142_s1, %s142_s1 }
  0x12   :  { %69 = vmatpush1.msra.mxu0 %v24_v10  ;;  %v138_v27 = vld [vmem:[%s296_s2] ss:$0 sm:$0xff] }
  0x13   :  { %70 = vmatprep.subr.mxu0 %v164_v1  ;;  %p149_p3 = por %p148_p2, %p147_p1 }
  0x14   :  { %71 = vmatpush1.msra.mxu0 %v23_v11 }
  0x15   :  { %72 = vmatprep.subr.mxu0 %v164_v1  ;;  %p150_p4 = pnand %p149_p3, %p143_p0 }
  0x16   :  { %73 = vmatpush1.msra.mxu0 %v22_v12 }
  0x17   :  { %74 = vmatprep.subr.mxu0 %v164_v1 }
  0x18   :  { %75 = vmatpush1.msra.mxu0 %v21_v13 }
  0x19   :  { %76 = vmatprep.subr.mxu0 %v164_v1 }
  0x1a   :  { %77 = vmatpush1.msra.mxu0 %v20_v14 }
  0x1b   :  { %78 = vmatprep.subr.mxu0 %v164_v1 }
  0x1c   :  { %79 = vmatpush1.msra.mxu0 %v19_v15 }
  0x1d   :  { %80 = vmatprep.subr.mxu0 %v164_v1 }
  0x1e   :  { %81 = vmatpush1.msra.mxu0 %v18_v16 }
  0x1f   :  { %82 = vmatprep.subr.mxu0 %v164_v1 }
  0x20   :  { %83 = vmatpush1.msra.mxu0 %v17_v17 }
  0x21   :  { %100 = vmatprep.subr.mxu0 %v164_v1 }
  0x22   :  { %101 = vmatpush2.msra.mxu0 %v40_v18 }
  0x23   :  { %102 = vmatprep.subr.mxu0 %v164_v1 }
  0x24   :  { %103 = vmatpush2.msra.mxu0 %v39_v19 }
  0x25   :  { %104 = vmatprep.subr.mxu0 %v164_v1 }
  0x26   :  { %105 = vmatpush2.msra.mxu0 %v38_v20 }
  0x27   :  { %106 = vmatprep.subr.mxu0 %v164_v1 }
  0x28   :  { %107 = vmatpush2.msra.mxu0 %v37_v21 }
  0x29   :  { %108 = vmatprep.subr.mxu0 %v164_v1 }
  0x2a   :  { %109 = vmatpush2.msra.mxu0 %v36_v22 }
  0x2b   :  { %110 = vmatprep.subr.mxu0 %v164_v1 }
  0x2c   :  { %111 = vmatpush2.msra.mxu0 %v35_v23 }
  0x2d   :  { %112 = vmatprep.subr.mxu0 %v164_v1 }
  0x2e   :  { %113 = vmatpush2.msra.mxu0 %v34_v24 }
  0x2f   :  { %114 = vmatprep.subr.mxu0 %v164_v1 }
  0x30   :  { %115 = vmatpush2.msra.mxu0 %v33_v25 }
  0x31   :  { %117 = vmatmul.mubr.f32.vlgmr.msra.gmra.mxu0 %v15_v26 }
  0xf1   :  { %v118_v28 = vpop.f32.mrf.mxu0 }
  0xf2   :  { %v119_v29 = vadd.f32 %v138_v27, %v118_v28 }
  0xf3   :  { %v120_v30 = vpop.f32.mrf.mxu0 }
  0xf4   :  { %123 = vst.msk [vmem:[#allocation2] sm:$0xff] %vm122_vm1, %v119_v29 }
  0xf5   :  { %153 = shalt.err (!%p150_p4)
}
  0xf6   :  { %133 = dma.vmem_to_hbm [thread:$0]  %s131_s13, 128, %s297_s3, [#allocation3]  }
  0xf7   :  { %162 = dma.done.wait [#allocation3], 128  }
  0xf8   :  { %163 = vsyncadd [#allocation3], 4294967168 }
  0xf9   :  { %137 = vsyncpa [#allocation3], 1 }

</bundles_post_ra>
